<compile_context>
chip_gen: v5e
topology: v5e:2x2
jax: 0.10.0
libtpu: 0.0.40
codegen_flags: <defaults>
</compile_context>

<pallas_src>
import functools

import jax
import jax.numpy as jnp
from jax.experimental import pallas as pl
from jax.experimental.pallas import tpu as pltpu

_LN_EPS = 1e-5  # torch.nn.LayerNorm default


# ----------------------------------------------------------------------------
# Pallas kernels
# ----------------------------------------------------------------------------
def _linear_kernel(x_ref, w_ref, b_ref, o_ref):
    o_ref[...] = (
        jnp.dot(x_ref[...].astype(w_ref.dtype), w_ref[...],
                preferred_element_type=jnp.float32)
        + b_ref[...]
    ).astype(o_ref.dtype)


def linear_pallas(x, w, b, *, tm=256):
    """y = x @ w + b, row-tiled (double-buffered pipeline), bf16 weights OK."""
    M, K = x.shape
    N = w.shape[1]
    tm = min(tm, M)
    return pl.pallas_call(
        _linear_kernel,
        out_shape=jax.ShapeDtypeStruct((M, N), jnp.float32),
        grid=(pl.cdiv(M, tm),),
        in_specs=[
            pl.BlockSpec((tm, K), lambda i: (i, 0)),
            pl.BlockSpec((K, N), lambda i: (0, 0)),
            pl.BlockSpec((1, N), lambda i: (0, 0)),
        ],
        out_specs=pl.BlockSpec((tm, N), lambda i: (i, 0)),
        compiler_params=pltpu.CompilerParams(
            dimension_semantics=("parallel",),
            vmem_limit_bytes=64 * 1024 * 1024),
    )(x, w, b.reshape(1, N))


def _layernorm(x, g, b, eps):
    mu = jnp.mean(x, axis=-1, keepdims=True)
    xc = x - mu
    var = jnp.mean(xc * xc, axis=-1, keepdims=True)
    return xc * jax.lax.rsqrt(var + eps) * g + b


def _ln_kernel(x_ref, g_ref, b_ref, o_ref, *, eps):
    o_ref[...] = _layernorm(x_ref[...], g_ref[...], b_ref[...], eps).astype(o_ref.dtype)


def layernorm_pallas(x, g, b, *, eps=_LN_EPS, tm=512):
    M, C = x.shape
    tm = min(tm, M)
    return pl.pallas_call(
        functools.partial(_ln_kernel, eps=eps),
        out_shape=jax.ShapeDtypeStruct((M, C), jnp.float32),
        grid=(pl.cdiv(M, tm),),
        in_specs=[
            pl.BlockSpec((tm, C), lambda i: (i, 0)),
            pl.BlockSpec((1, C), lambda i: (0, 0)),
            pl.BlockSpec((1, C), lambda i: (0, 0)),
        ],
        out_specs=pl.BlockSpec((tm, C), lambda i: (i, 0)),
        compiler_params=pltpu.CompilerParams(dimension_semantics=("parallel",)),
    )(x, g.reshape(1, C), b.reshape(1, C))


# Parameter ordering for the fused transformer-block kernel.
_BLOCK_PARAM_ORDER = (
    "ln1g", "ln1b", "wqkv", "bqkv", "wo", "bo",
    "ln2g", "ln2b", "wfc1", "bfc1", "wfc2", "bfc2",
)


def _block_kernel(x_ref, ln1g_ref, ln1b_ref, wqkv_ref, bqkv_ref, wo_ref, bo_ref,
                  ln2g_ref, ln2b_ref, wfc1_ref, bfc1_ref, wfc2_ref, bfc2_ref,
                  o_ref, *, num_heads, head_dim, block_b, seq_len, t_real):
    """Pre-LN ViT block: x += MHSA(LN1(x)); x += MLP(LN2(x)).

    Block = `block_b` sequences of (padded) length `seq_len`; tokens beyond
    `t_real` are padding and masked out of the attention key columns.
    """
    C = num_heads * head_dim
    Bb, Tp = block_b, seq_len
    scale = head_dim ** -0.5

    x = x_ref[...].reshape(Bb * Tp, C)          # Tp % 8 == 0 -> layout-trivial

    # ---- attention: fused QKV matmul, batched per-head score / PV dots ----
    h = _layernorm(x, ln1g_ref[...], ln1b_ref[...], _LN_EPS)
    qkv = jnp.dot(h.astype(wqkv_ref.dtype), wqkv_ref[...],
                  preferred_element_type=jnp.float32) + bqkv_ref[...]   # (Bb*Tp, 3C)

    if seq_len > t_real:                        # mask padded key columns
        kmask = jax.lax.broadcasted_iota(jnp.int32, (1, Tp), 1) < t_real
    else:
        kmask = None

    heads = []
    for hd in range(num_heads):                 # small static unroll over heads
        lo = hd * head_dim
        q = qkv[:, lo:lo + head_dim].reshape(Bb, Tp, head_dim)
        k = qkv[:, C + lo:C + lo + head_dim].reshape(Bb, Tp, head_dim)
        v = qkv[:, 2 * C + lo:2 * C + lo + head_dim].reshape(Bb, Tp, head_dim)
        s = jax.lax.dot_general(q, k, (((2,), (2,)), ((0,), (0,))),
                                preferred_element_type=jnp.float32) * scale
        if kmask is not None:
            s = jnp.where(kmask, s, jnp.float32(-1e30))
        s = s - jnp.max(s, axis=-1, keepdims=True)
        p = jnp.exp(s)
        p = p * pl.reciprocal(jnp.sum(p, axis=-1, keepdims=True), approx=True)
        heads.append(jax.lax.dot_general(p, v, (((2,), (1,)), ((0,), (0,))),
                                         preferred_element_type=jnp.float32))
    attn = jnp.concatenate(heads, axis=-1).reshape(Bb * Tp, C)
    attn = jnp.dot(attn.astype(wo_ref.dtype), wo_ref[...],
                   preferred_element_type=jnp.float32) + bo_ref[...]
    x = x + attn

    # ---- MLP ----
    h2 = _layernorm(x, ln2g_ref[...], ln2b_ref[...], _LN_EPS)
    m = jnp.dot(h2.astype(wfc1_ref.dtype), wfc1_ref[...],
                preferred_element_type=jnp.float32) + bfc1_ref[...]
    m = jax.nn.gelu(m, approximate=False)       # exact GELU, matches torch.nn.GELU
    m = jnp.dot(m.astype(wfc2_ref.dtype), wfc2_ref[...],
                preferred_element_type=jnp.float32) + bfc2_ref[...]
    o_ref[...] = (x + m).reshape(Bb, Tp, C).astype(o_ref.dtype)


def transformer_block(x, p, num_heads, *, t_real):
    """x: (B, Tp, C) with Tp % 8 == 0; grid over batch, block_b sequences/step."""
    B, Tp, C = x.shape
    head_dim = C // num_heads
    block_b = max(1, min(B, max(1, 256 // Tp)))
    while B % block_b:
        block_b -= 1
    params = [p[name] for name in _BLOCK_PARAM_ORDER]

    def _const_map(i, nd):
        return (0,) * nd

    in_specs = [pl.BlockSpec((block_b, Tp, C), lambda i: (i, 0, 0))]
    in_specs += [pl.BlockSpec(a.shape, functools.partial(_const_map, nd=a.ndim))
                 for a in params]
    kernel = functools.partial(
        _block_kernel, num_heads=num_heads, head_dim=head_dim,
        block_b=block_b, seq_len=Tp, t_real=t_real)
    # Note: weight specs have constant index maps; on v7x they could additionally
    # be single-buffered (pipeline_mode) to halve resident weight VMEM.
    return pl.pallas_call(
        kernel,
        out_shape=jax.ShapeDtypeStruct((B, Tp, C), jnp.float32),
        grid=(B // block_b,),
        in_specs=in_specs,
        out_specs=pl.BlockSpec((block_b, Tp, C), lambda i: (i, 0, 0)),
        compiler_params=pltpu.CompilerParams(
            dimension_semantics=("parallel",),
            vmem_limit_bytes=64 * 1024 * 1024),
    )(x, *params)


def run_transformer(x, blocks, num_heads):
    """Pad the token dim to a multiple of 8 once, run all blocks, slice back."""
    B, T, C = x.shape
    Tp = ((T + 7) // 8) * 8
    if Tp != T:
        x = jnp.pad(x, ((0, 0), (0, Tp - T), (0, 0)))
    for bp in blocks:
        x = transformer_block(x, bp, num_heads, t_real=T)
    return x[:, :T]


def _head_loss_kernel(x_ref, w_ref, b_ref, y_ref, m_ref, acc_ref, *, tm, nrows):
    """Fused decoder head + masked squared-error reduction (patch domain)."""
    @pl.when(pl.program_id(0) == 0)
    def _():
        acc_ref[0, 0] = jnp.float32(0.0)
    pred = jnp.dot(x_ref[...].astype(w_ref.dtype), w_ref[...],
                   preferred_element_type=jnp.float32) + b_ref[...]
    d = pred - y_ref[...]
    row = jax.lax.broadcasted_iota(jnp.int32, d.shape, 0) + pl.program_id(0) * tm
    acc_ref[0, 0] += jnp.sum(jnp.where(row < nrows, d * d * m_ref[...], 0.0))


def head_masked_mse_sum(x, w, b, y, m, *, tm=256):
    """sum(((x @ w + b) - y)^2 * m) without materializing the prediction in HBM."""
    M, C = x.shape
    pdim = w.shape[1]
    tm = min(tm, M)
    acc = pl.pallas_call(
        functools.partial(_head_loss_kernel, tm=tm, nrows=M),
        out_shape=jax.ShapeDtypeStruct((1, 1), jnp.float32),
        grid=(pl.cdiv(M, tm),),
        in_specs=[
            pl.BlockSpec((tm, C), lambda i: (i, 0)),
            pl.BlockSpec((C, pdim), lambda i: (0, 0)),
            pl.BlockSpec((1, pdim), lambda i: (0, 0)),
            pl.BlockSpec((tm, pdim), lambda i: (i, 0)),
            pl.BlockSpec((tm, 1), lambda i: (i, 0)),
        ],
        out_specs=pl.BlockSpec((1, 1), lambda i: (0, 0),
                               memory_space=pltpu.MemorySpace.SMEM),
        compiler_params=pltpu.CompilerParams(dimension_semantics=("arbitrary",)),
    )(x, w, b.reshape(1, pdim), y, m)
    return acc[0, 0]


# ----------------------------------------------------------------------------
# JAX glue (gathers, shuffles, reshapes, parameter setup)
# ----------------------------------------------------------------------------
def take_along_tokens(x, idx):
    # x: (B, T, C), idx: (B, T') -> (B, T', C), gather along the token axis.
    return jnp.take_along_axis(x, idx[:, :, None], axis=1)


def patchify(img, patch_size):
    # (B, 3, H, W) -> (B, N, 3*p*p) with '(h w)' patch order and '(c p1 p2)'
    # feature order: the exact inverse of the reference patch2img rearrange.
    B, Cc, H, W = img.shape
    p = patch_size
    hh, ww = H // p, W // p
    x = img.reshape(B, Cc, hh, p, ww, p).transpose(0, 2, 4, 1, 3, 5)
    return x.reshape(B, hh * ww, Cc * p * p)


def _init_block_params(key, C):
    ks = jax.random.split(key, 4)
    nb = lambda k, s: (jax.random.normal(k, s) * 0.02).astype(jnp.bfloat16)
    zf = lambda s: jnp.zeros(s, jnp.float32)
    return dict(
        ln1g=jnp.ones((1, C), jnp.float32), ln1b=zf((1, C)),
        wqkv=nb(ks[0], (C, 3 * C)), bqkv=zf((1, 3 * C)),
        wo=nb(ks[1], (C, C)), bo=zf((1, C)),
        ln2g=jnp.ones((1, C), jnp.float32), ln2b=zf((1, C)),
        wfc1=nb(ks[2], (C, 4 * C)), bfc1=zf((1, 4 * C)),
        wfc2=nb(ks[3], (4 * C, C)), bfc2=zf((1, C)),
    )


def init_mae_params(key, *, image_size, patch_size, emb_dim, enc_layers, dec_layers):
    N = (image_size // patch_size) ** 2
    pdim = 3 * patch_size ** 2
    keys = list(jax.random.split(key, 6 + enc_layers + dec_layers))
    kit = iter(keys)
    nf = lambda s: (jax.random.normal(next(kit), s) * 0.02).astype(jnp.float32)
    nb = lambda s: (jax.random.normal(next(kit), s) * 0.02).astype(jnp.bfloat16)
    enc = dict(
        patch_w=nb((pdim, emb_dim)),                      # conv kernel flattened
        patch_b=jnp.zeros((emb_dim,), jnp.float32),
        cls=nf((1, 1, emb_dim)),
        pos=nf((1, N, emb_dim)),
        blocks=[_init_block_params(next(kit), emb_dim) for _ in range(enc_layers)],
        lng=jnp.ones((emb_dim,), jnp.float32),
        lnb=jnp.zeros((emb_dim,), jnp.float32),
    )
    dec = dict(
        mask_token=nf((1, 1, emb_dim)),
        pos=nf((1, N + 1, emb_dim)),
        blocks=[_init_block_params(next(kit), emb_dim) for _ in range(dec_layers)],
        head_w=nb((emb_dim, pdim)),
        head_b=jnp.zeros((pdim,), jnp.float32),
    )
    return dict(enc=enc, dec=dec)


def mae_forward(img, params, shuffle_key, *, image_size, patch_size, emb_dim,
                num_heads, mask_ratio):
    """Returns (loss, [clf_features], [clf_features]) like MAE.forward."""
    B = img.shape[0]
    p = patch_size
    N = (image_size // p) ** 2
    pdim = 3 * p * p
    remain_T = int(N * (1 - mask_ratio))
    enc, dec = params["enc"], params["dec"]

    # ----- encoder: patchify (Conv2d stride=p == per-patch matmul) + pos -----
    img_patches = patchify(img, p)                                    # (B, N, pdim)
    tok = linear_pallas(img_patches.reshape(B * N, pdim),
                        enc["patch_w"], enc["patch_b"]).reshape(B, N, emb_dim)
    tok = tok + enc["pos"]

    # ----- per-sample random patch shuffle -----
    perm_keys = jax.random.split(shuffle_key, B)
    fwd_idx = jax.vmap(lambda k: jax.random.permutation(k, N))(perm_keys)
    fwd_idx = fwd_idx.astype(jnp.int32)                               # (B, N)
    bwd_idx = jnp.argsort(fwd_idx, axis=1).astype(jnp.int32)          # (B, N)
    visible = take_along_tokens(tok, fwd_idx[:, :remain_T])           # (B, rT, C)

    x = jnp.concatenate(
        [jnp.broadcast_to(enc["cls"], (B, 1, emb_dim)), visible], axis=1)
    T = x.shape[1]                                                    # remain_T + 1
    x = run_transformer(x, enc["blocks"], num_heads)
    features = layernorm_pallas(
        x.reshape(B * T, emb_dim), enc["lng"], enc["lnb"]).reshape(B, T, emb_dim)
    clf_features = features[:, 0]                                     # (B, C)

    # ----- decoder -----
    bwd_full = jnp.concatenate(
        [jnp.zeros((B, 1), jnp.int32), bwd_idx + 1], axis=1)          # (B, N+1)
    feats = jnp.concatenate(
        [features, jnp.broadcast_to(dec["mask_token"], (B, N + 1 - T, emb_dim))],
        axis=1)
    feats = take_along_tokens(feats, bwd_full) + dec["pos"]           # (B, N+1, C)
    feats = run_transformer(feats, dec["blocks"], num_heads)
    dec_tok = feats[:, 1:]                                            # (B, N, C)

    # ----- fused head + masked MSE (patch domain; patch2img is a bijection) -----
    mask = (bwd_idx >= remain_T).astype(jnp.float32)                  # (B, N)
    sq_sum = head_masked_mse_sum(
        dec_tok.reshape(B * N, emb_dim), dec["head_w"], dec["head_b"],
        img_patches.reshape(B * N, pdim), mask.reshape(B * N, 1))
    loss = sq_sum / (B * N * pdim) / mask_ratio

    return loss, [clf_features], [clf_features]


# ----------------------------------------------------------------------------
if __name__ == "__main__":
    IMAGE_SIZE, PATCH_SIZE = 16, 2
    EMB_DIM, NUM_HEADS = 32, 4
    ENC_LAYERS, DEC_LAYERS = 2, 2
    MASK_RATIO = 0.75
    B = 2

    key = jax.random.PRNGKey(0)
    pkey, xkey, skey = jax.random.split(key, 3)
    params = init_mae_params(
        pkey, image_size=IMAGE_SIZE, patch_size=PATCH_SIZE, emb_dim=EMB_DIM,
        enc_layers=ENC_LAYERS, dec_layers=DEC_LAYERS)
    img = jax.random.normal(xkey, (B, 3, IMAGE_SIZE, IMAGE_SIZE), jnp.float32)

    loss, clf_list, _ = mae_forward(
        img, params, skey, image_size=IMAGE_SIZE, patch_size=PATCH_SIZE,
        emb_dim=EMB_DIM, num_heads=NUM_HEADS, mask_ratio=MASK_RATIO)

    jax.block_until_ready((loss, clf_list[0]))
    assert clf_list[0].shape == (B, EMB_DIM)
    assert loss.shape == () and bool(jnp.isfinite(loss))
    print("KERNEL_OK")
</pallas_src>

<mosaic_0001>
module attributes {stable_mosaic.version = 11 : i64} {
  func.func @_linear_kernel(%arg0: i32, %arg1: memref<128x12xf32, #tpu.memory_space<vmem>>, %arg2: memref<12x32xbf16, #tpu.memory_space<vmem>>, %arg3: memref<1x32xf32, #tpu.memory_space<vmem>>, %arg4: memref<128x32xf32, #tpu.memory_space<vmem>>) attributes {dimension_semantics = [#tpu.dimension_semantics<parallel>], iteration_bounds = array<i64: 1>, scalar_prefetch = 0 : i64, scratch_operands = 0 : i64, tpu.core_type = #tpu.core_type<tc>, window_params = [{transform_indices = @transform_0, window_bounds = array<i64: 128, 12>}, {pipeline_mode = #tpu.pipeline_mode<synchronous>, transform_indices = @transform_1, window_bounds = array<i64: 12, 32>}, {pipeline_mode = #tpu.pipeline_mode<synchronous>, transform_indices = @transform_2, window_bounds = array<i64: 1, 32>}, {transform_indices = @transform_3, window_bounds = array<i64: 128, 32>}]} {
    %c0 = arith.constant 0 : index
    %c0_0 = arith.constant 0 : index
    %0 = vector.load %arg1[%c0, %c0_0] : memref<128x12xf32, #tpu.memory_space<vmem>>, vector<128x12xf32>
    %1 = arith.truncf %0 : vector<128x12xf32> to vector<128x12xbf16>
    %c0_1 = arith.constant 0 : index
    %c0_2 = arith.constant 0 : index
    %2 = vector.load %arg2[%c0_1, %c0_2] : memref<12x32xbf16, #tpu.memory_space<vmem>>, vector<12x32xbf16>
    %cst = arith.constant dense<0.000000e+00> : vector<128x32xf32>
    %3 = tpu.matmul %1, %2, %cst {dimension_numbers = #tpu.dot_dimension_numbers<[1], [0], [0], [1], [0, 0, 1, 1], [], []>} : vector<128x12xbf16>, vector<12x32xbf16>, vector<128x32xf32> -> vector<128x32xf32>
    %c0_3 = arith.constant 0 : index
    %c0_4 = arith.constant 0 : index
    %4 = vector.load %arg3[%c0_3, %c0_4] : memref<1x32xf32, #tpu.memory_space<vmem>>, vector<1x32xf32>
    %5 = vector.broadcast %4 : vector<1x32xf32> to vector<128x32xf32>
    %6 = arith.addf %3, %5 : vector<128x32xf32>
    %c0_5 = arith.constant 0 : index
    %c0_6 = arith.constant 0 : index
    %7 = vector.load %arg4[%c0_5, %c0_6] : memref<128x32xf32, #tpu.memory_space<vmem>>, vector<128x32xf32>
    tpu.vector_store %arg4[%c0_5, %c0_6], %6 {strides = array<i32>} : memref<128x32xf32, #tpu.memory_space<vmem>>, vector<128x32xf32>,
    return
  }
  func.func @transform_0(%arg0: i32) -> (i32, i32) {
    %c0_i32 = arith.constant 0 : i32
    %c0_i32_0 = arith.constant 0 : i32
    return %arg0, %c0_i32 : i32, i32
  }
  func.func @transform_1(%arg0: i32) -> (i32, i32) {
    %c0_i32 = arith.constant 0 : i32
    %c0_i32_0 = arith.constant 0 : i32
    %c0_i32_1 = arith.constant 0 : i32
    return %c0_i32, %c0_i32_0 : i32, i32
  }
  func.func @transform_2(%arg0: i32) -> (i32, i32) {
    %c0_i32 = arith.constant 0 : i32
    %c0_i32_0 = arith.constant 0 : i32
    %c0_i32_1 = arith.constant 0 : i32
    return %c0_i32, %c0_i32_0 : i32, i32
  }
  func.func @transform_3(%arg0: i32) -> (i32, i32) {
    %c0_i32 = arith.constant 0 : i32
    %c0_i32_0 = arith.constant 0 : i32
    return %arg0, %c0_i32 : i32, i32
  }
}

</mosaic_0001>

<bundles_post_ra>
// kernel: tpu_custom_call.1
= control target key start
LH: loop header
LB: loop body
LE: loop exit
PB: predicated region body
PF: predicated region fallthrough
CT: control target
= control target key end

     0   :  { %vm75_vm0 = vcmask 1045504   ;;  %vm50_vm1 = vcmask 97280   ;;  %vm128_vm2 = vcmask 261120   ;;  %s315_s1 = inlined_call_operand.vmem [shape: bf16[12,32], index: 1, kind: input, shape index: {}]   ;;  %s316_s0 = inlined_call_operand.vmem [shape: f32[128,12], index: 0, kind: input, shape index: {}]   ;;  %s317_s2 = inlined_call_operand.vmem [shape: f32[1,32], index: 2, kind: input, shape index: {}]   ;;  %s318_s3 = inlined_call_operand.vmem [shape: f32[128,32], index: 3, kind: output, shape index: {}]  }
   0x1   :  { %v151_v0 = vld [vmem:[%s315_s1] sm:$0xf]  ;;  %v161_v1 = vld [vmem:[%s315_s1] sm:$0x30]  ;;  %v16_v4 = vld [vmem:[%s316_s0 + $0x8] sm:$0xff] }
   0x2   :  { %v15_v2 = vld [vmem:[%s316_s0] sm:$0xff]  ;;  %v152_v3 = vor.u32 %v161_v1, %v151_v0  ;;  %v20_v6 = vld [vmem:[%s316_s0 + $0x28] sm:$0xff]  ;;  %v17_v16 = vld [vmem:[%s316_s0 + $0x10] sm:$0xff] }
   0x3   :  { %v19_v5 = vld [vmem:[%s316_s0 + $0x20] sm:$0xff]  ;;  %v24_v8 = vld [vmem:[%s316_s0 + $0x48] sm:$0xff]  ;;  %v31_v11 = vpack.c.bf16 %v16_v4, %v15_v2  ;;  %v18_v17 = vld [vmem:[%s316_s0 + $0x18] sm:$0xff] }
   0x4   :  { %v23_v7 = vld [vmem:[%s316_s0 + $0x40] sm:$0xff]  ;;  %v77_v10 = vsel %vm75_vm0, %v152_v3, 0  ;;  %v33_v12 = vpack.c.bf16 %v20_v6, %v19_v5  ;;  %v28_v13 = vld [vmem:[%s316_s0 + $0x68] sm:$0xff]  ;;  %v21_v18 = vld [vmem:[%s316_s0 + $0x30] sm:$0xff]  ;;  %v32_v24 = vpack.c.bf16 %v18_v17, %v17_v16 }
   0x5   :  { %v27_v9 = vld [vmem:[%s316_s0 + $0x60] sm:$0xff]  ;;  %86 = vmatpush.bf16.msra.mxu0 %v77_v10  ;;  %162 = vmatpush.bf16.msra.mxu1 %v77_v10  ;;  %v35_v14 = vpack.c.bf16 %v24_v8, %v23_v7  ;;  %v22_v19 = vld [vmem:[%s316_s0 + $0x38] sm:$0xff]  ;;  %v25_v20 = vld [vmem:[%s316_s0 + $0x50] sm:$0xff] }
   0x6   :  { %v37_v15 = vpack.c.bf16 %v28_v13, %v27_v9  ;;  %163 = vmatpush.bf16.msra.mxu2 %v77_v10  ;;  %164 = vmatpush.bf16.msra.mxu3 %v77_v10  ;;  %v26_v21 = vld [vmem:[%s316_s0 + $0x58] sm:$0xff]  ;;  %v29_v22 = vld [vmem:[%s316_s0 + $0x70] sm:$0xff]  ;;  %v34_v25 = vpack.c.bf16 %v22_v19, %v21_v18  ;;  %v165_v28 = vld [vmem:[%s317_s2] ss:$0 sm:$0xff] }
   0x7   :  { %v30_v23 = vld [vmem:[%s316_s0 + $0x78] sm:$0xff]  ;;  %v36_v26 = vpack.c.bf16 %v26_v21, %v25_v20 }
   0x8   :  { %153 = vmatmul.msk.bf16.vlgmr.msra.gmra.mxu0 %vm50_vm1, %v31_v11  ;;  %155 = vmatmul.msk.bf16.vlgmr.msra.gmra.mxu1 %vm50_vm1, %v33_v12  ;;  %v38_v27 = vpack.c.bf16 %v30_v23, %v29_v22 }
   0x9   :  { %157 = vmatmul.msk.bf16.vlgmr.msra.gmra.mxu2 %vm50_vm1, %v35_v14  ;;  %159 = vmatmul.msk.bf16.vlgmr.msra.gmra.mxu3 %vm50_vm1, %v37_v15 }
  0x18   :  { %154 = vmatmul.msk.bf16.gmra.mxu0 %vm50_vm1, %v32_v24  ;;  %156 = vmatmul.msk.bf16.gmra.mxu1 %vm50_vm1, %v34_v25 }
  0x19   :  { %158 = vmatmul.msk.bf16.gmra.mxu2 %vm50_vm1, %v36_v26  ;;  %160 = vmatmul.msk.bf16.gmra.mxu3 %vm50_vm1, %v38_v27 }
  0x85   :  { %v88_v29 = vpop.f32.mrf.mxu0  ;;  %v98_v30 = vpop.f32.mrf.mxu1 }
  0x86   :  { %v89_v31 = vadd.f32 %v165_v28, %v88_v29  ;;  %v99_v32 = vadd.f32 %v165_v28, %v98_v30 }
  0x88   :  { %129 = vst.msk [vmem:[%s318_s3] sm:$0xff] %vm128_vm2, %v89_v31 }
  0x89   :  { %133 = vst.msk [vmem:[%s318_s3 + $0x20] sm:$0xff] %vm128_vm2, %v99_v32 }
  0x8c   :  { %v108_v33 = vpop.f32.mrf.mxu2  ;;  %v118_v34 = vpop.f32.mrf.mxu3 }
  0x8d   :  { %v109_v35 = vadd.f32 %v165_v28, %v108_v33  ;;  %v119_v36 = vadd.f32 %v165_v28, %v118_v34  ;;  %v90_v37 = vpop.f32.mrf.mxu0  ;;  %v100_v38 = vpop.f32.mrf.mxu1 }
  0x8e   :  { %v91_v39 = vadd.f32 %v165_v28, %v90_v37  ;;  %v101_v40 = vadd.f32 %v165_v28, %v100_v38 }
  0x8f   :  { %137 = vst.msk [vmem:[%s318_s3 + $0x40] sm:$0xff] %vm128_vm2, %v109_v35 }
  0x90   :  { %141 = vst.msk [vmem:[%s318_s3 + $0x60] sm:$0xff] %vm128_vm2, %v119_v36 }
  0x91   :  { %130 = vst.msk [vmem:[%s318_s3 + $0x8] sm:$0xff] %vm128_vm2, %v91_v39 }
  0x92   :  { %134 = vst.msk [vmem:[%s318_s3 + $0x28] sm:$0xff] %vm128_vm2, %v101_v40 }
  0x94   :  { %v110_v41 = vpop.f32.mrf.mxu2  ;;  %v120_v42 = vpop.f32.mrf.mxu3 }
  0x95   :  { %v111_v43 = vadd.f32 %v165_v28, %v110_v41  ;;  %v121_v44 = vadd.f32 %v165_v28, %v120_v42  ;;  %v93_v45 = vpop.f32.mrf.mxu0  ;;  %v103_v46 = vpop.f32.mrf.mxu1 }
  0x96   :  { %v94_v47 = vadd.f32 %v165_v28, %v93_v45  ;;  %v104_v48 = vadd.f32 %v165_v28, %v103_v46 }
  0x97   :  { %138 = vst.msk [vmem:[%s318_s3 + $0x48] sm:$0xff] %vm128_vm2, %v111_v43 }
  0x98   :  { %142 = vst.msk [vmem:[%s318_s3 + $0x68] sm:$0xff] %vm128_vm2, %v121_v44 }
  0x99   :  { %131 = vst.msk [vmem:[%s318_s3 + $0x10] sm:$0xff] %vm128_vm2, %v94_v47 }
  0x9a   :  { %135 = vst.msk [vmem:[%s318_s3 + $0x30] sm:$0xff] %vm128_vm2, %v104_v48 }
  0x9c   :  { %v113_v49 = vpop.f32.mrf.mxu2  ;;  %v123_v50 = vpop.f32.mrf.mxu3 }
  0x9d   :  { %v114_v51 = vadd.f32 %v165_v28, %v113_v49  ;;  %v124_v52 = vadd.f32 %v165_v28, %v123_v50  ;;  %v95_v53 = vpop.f32.mrf.mxu0  ;;  %v105_v54 = vpop.f32.mrf.mxu1 }
  0x9e   :  { %v96_v55 = vadd.f32 %v165_v28, %v95_v53  ;;  %v106_v56 = vadd.f32 %v165_v28, %v105_v54 }
  0x9f   :  { %139 = vst.msk [vmem:[%s318_s3 + $0x50] sm:$0xff] %vm128_vm2, %v114_v51 }
  0xa0   :  { %143 = vst.msk [vmem:[%s318_s3 + $0x70] sm:$0xff] %vm128_vm2, %v124_v52 }
  0xa1   :  { %132 = vst.msk [vmem:[%s318_s3 + $0x18] sm:$0xff] %vm128_vm2, %v96_v55 }
  0xa2   :  { %136 = vst.msk [vmem:[%s318_s3 + $0x38] sm:$0xff] %vm128_vm2, %v106_v56 }
  0xa4   :  { %v115_v57 = vpop.f32.mrf.mxu2  ;;  %v125_v58 = vpop.f32.mrf.mxu3 }
  0xa5   :  { %v116_v59 = vadd.f32 %v165_v28, %v115_v57  ;;  %v126_v60 = vadd.f32 %v165_v28, %v125_v58 }
  0xa7   :  { %140 = vst.msk [vmem:[%s318_s3 + $0x58] sm:$0xff] %vm128_vm2, %v116_v59 }
  0xa8   :  { %144 = vst.msk [vmem:[%s318_s3 + $0x78] sm:$0xff] %vm128_vm2, %v126_v60 }

</bundles_post_ra>
